<compile_context>
chip_gen: v6e
topology: v6e:2x2x1
jax: 0.10.0
libtpu: 0.0.40
codegen_flags: <defaults>
</compile_context>

<pallas_src>
import jax
import jax.numpy as jnp
from jax.experimental import pallas as pl
from jax.experimental.pallas import tpu as pltpu

_LANES = 128
_TARGET_BLOCK_BYTES = 2 * 1024 * 1024  # 2 MiB block -> ~8 MiB double-buffered,
                                        # safe on v5e/v6e/v7x scoped VMEM.


def _identity_kernel(x_ref, o_ref):
    # Straight VMEM copy of the current tile (DMA-bound; nothing to compute).
    o_ref[...] = x_ref[...]


def _tiled_copy(x2d, *, alias):
    rows, lanes = x2d.shape
    itemsize = x2d.dtype.itemsize
    # Sublane packing: 8 rows (32-bit), 16 rows (16-bit), 32 rows (8-bit).
    row_align = 8 * max(1, 4 // itemsize)
    rows_per_block = max(
        row_align,
        (_TARGET_BLOCK_BYTES // (lanes * itemsize)) // row_align * row_align,
    )
    # Bounded tile: either the full (small) array, or an aligned multi-MiB tile.
    tile_rows = rows if rows <= rows_per_block else rows_per_block
    grid = (pl.cdiv(rows, tile_rows),)
    nbytes = rows * lanes * itemsize

    return pl.pallas_call(
        _identity_kernel,
        out_shape=jax.ShapeDtypeStruct((rows, lanes), x2d.dtype),
        grid_spec=pltpu.PrefetchScalarGridSpec(
            num_scalar_prefetch=0,
            grid=grid,
            in_specs=[pl.BlockSpec((tile_rows, lanes), lambda i: (i, 0))],
            out_specs=pl.BlockSpec((tile_rows, lanes), lambda i: (i, 0)),
        ),
        compiler_params=pltpu.CompilerParams(
            dimension_semantics=("parallel",),      # v7x: shard grid over 2 TCs
            vmem_limit_bytes=32 * 1024 * 1024,      # explicit budget, all gens
        ),
        cost_estimate=pl.CostEstimate(
            flops=0, transcendentals=0, bytes_accessed=2 * nbytes),
        # Alias output onto the input buffer; with jit(donate_argnums=0) the
        # "copy" writes back into the same HBM array (no second allocation).
        input_output_aliases={0: 0} if alias else {},
    )(x2d)


def identity(x):
    """Pallas implementation of torch.nn.Identity: returns x unchanged."""
    orig_shape = x.shape
    n = x.size
    if n == 0:
        return x

    if n % _LANES == 0:
        # Common case: lane-dense 2D view with no padding and no trailing slice.
        rows = n // _LANES
        out2d = _tiled_copy(x.reshape(rows, _LANES), alias=True)
        return out2d.reshape(orig_shape)

    # Ragged fallback: pad the flat view up to an aligned (rows, 128) slab with
    # a bounded tile (never the whole array as a single VMEM block).
    # TODO(synk): this path still pays one pad + slice HBM round trip.
    itemsize = x.dtype.itemsize
    row_align = 8 * max(1, 4 // itemsize)
    rows = pl.cdiv(n, _LANES * row_align) * row_align
    flat = jnp.pad(jnp.ravel(x), (0, rows * _LANES - n))
    out2d = _tiled_copy(flat.reshape(rows, _LANES), alias=True)
    return out2d.reshape(-1)[:n].reshape(orig_shape)


if __name__ == "__main__":
    key = jax.random.PRNGKey(0)
    x = jax.random.normal(key, (2, 4, 16, 16), dtype=jnp.float32)  # NCHW

    # jit so the lane-dense reshapes are pure layout bitcasts (no extra copies).
    # For a fully in-place Identity, use jax.jit(identity, donate_argnums=0).
    identity_fn = jax.jit(identity)

    y = identity_fn(x)
    jax.block_until_ready(y)
    assert y.shape == x.shape and y.dtype == x.dtype
    assert bool(jnp.all(y == x))

    # Ragged-size fallback path (size not divisible by 128).
    x_ragged = jax.random.normal(jax.random.PRNGKey(1), (3, 5, 7), dtype=jnp.float32)
    y_ragged = jax.jit(identity)(x_ragged)
    jax.block_until_ready(y_ragged)
    assert y_ragged.shape == x_ragged.shape and y_ragged.dtype == x_ragged.dtype
    assert bool(jnp.all(y_ragged == x_ragged))

    print("KERNEL_OK")
</pallas_src>

<mosaic_0001>
module attributes {stable_mosaic.version = 11 : i64} {
  func.func @_identity_kernel(%arg0: i32, %arg1: memref<16x128xf32, #tpu.memory_space<vmem>>, %arg2: memref<16x128xf32, #tpu.memory_space<vmem>>) attributes {dimension_semantics = [#tpu.dimension_semantics<parallel>], iteration_bounds = array<i64: 1>, scalar_prefetch = 0 : i64, scratch_operands = 0 : i64, tpu.core_type = #tpu.core_type<tc>, window_params = [{transform_indices = @transform_0, window_bounds = array<i64: 16, 128>}, {transform_indices = @transform_1, window_bounds = array<i64: 16, 128>}]} {
    %c0 = arith.constant 0 : index
    %c0_0 = arith.constant 0 : index
    %0 = vector.load %arg1[%c0, %c0_0] : memref<16x128xf32, #tpu.memory_space<vmem>>, vector<16x128xf32>
    %c0_1 = arith.constant 0 : index
    %c0_2 = arith.constant 0 : index
    %1 = vector.load %arg2[%c0_1, %c0_2] : memref<16x128xf32, #tpu.memory_space<vmem>>, vector<16x128xf32>
    tpu.vector_store %arg2[%c0_1, %c0_2], %0 {strides = array<i32>} : memref<16x128xf32, #tpu.memory_space<vmem>>, vector<16x128xf32>,
    return
  }
  func.func @transform_0(%arg0: i32) -> (i32, i32) {
    %c0_i32 = arith.constant 0 : i32
    %c0_i32_0 = arith.constant 0 : i32
    return %arg0, %c0_i32 : i32, i32
  }
  func.func @transform_1(%arg0: i32) -> (i32, i32) {
    %c0_i32 = arith.constant 0 : i32
    %c0_i32_0 = arith.constant 0 : i32
    return %arg0, %c0_i32 : i32, i32
  }
}

</mosaic_0001>

<bundles_post_ra>
// kernel: identity.1
= control target key start
LH: loop header
LB: loop body
LE: loop exit
PB: predicated region body
PF: predicated region fallthrough
CT: control target
= control target key end

     0   :  { %s38_s0 = inlined_call_operand.vmem [shape: f32[16,128], index: 0, kind: input, shape index: {}, may-alias: {0,1}]   ;;  %s39_s1 = inlined_call_operand.vmem [shape: f32[16,128], index: 1, kind: output, shape index: {}, may-alias: {0,1}]  }
   0x1   :  { %v8_v0 = vld [vmem:[%s38_s0] sm:$0xff]  ;;  %v9_v1 = vld [vmem:[%s38_s0 + $0x8] sm:$0xff] }
   0x2   :  { %10 = vst [vmem:[%s39_s1] sm:$0xff] %v8_v0  ;;  %11 = vst [vmem:[%s39_s1 + $0x8] sm:$0xff] %v9_v1 }

</bundles_post_ra>
